<compile_context>
chip_gen: v7x
topology: tpu7x:2x2x1
jax: 0.10.0
libtpu: 0.0.40
codegen_flags: <defaults>
</compile_context>

<pallas_src>
import jax
import jax.numpy as jnp
from jax.experimental import pallas as pl
from jax.experimental.pallas import tpu as pltpu


# ----------------------------- Pallas kernels ------------------------------

def _log_kernel(x_ref, o_ref):
    o_ref[...] = jnp.log(x_ref[...].astype(jnp.float32)).astype(o_ref.dtype)


def _make_scale_log_kernel(scale):
    """Fused child: log(x * scale); scale is a compile-time Python float."""
    scale = float(scale)

    def kernel(x_ref, o_ref):
        o_ref[...] = jnp.log(
            x_ref[...].astype(jnp.float32) * scale).astype(o_ref.dtype)

    return kernel


# ----------------------------- tiling helpers ------------------------------

_PALLAS_MIN_BYTES = 256 * 1024   # below this: plain jnp (XLA fusion) wins
_MAX_B_TILE = 1024               # sublane-axis tile cap
_MAX_D_TILE = 2048               # lane-axis tile cap (multiple of 128)


def _chip_budgets():
    """(per-operand tile byte budget, scoped-VMEM limit) for the local chip."""
    kind = ""
    try:
        kind = jax.devices()[0].device_kind.lower()
    except Exception:
        pass
    if "v7" in kind:
        return 6 << 20, 48 << 20       # 3.2 TB/s HBM -> bigger tiles
    if "v6" in kind or "trillium" in kind:
        return 4 << 20, 32 << 20
    return 2 << 20, 24 << 20           # v5e and unknown chips: stay safe


def _sublane_unit(dtype):
    """Dtype-native sublane packing unit: 8 f32, 16 bf16, 32 int8/fp8."""
    return max(8, 32 // jnp.dtype(dtype).itemsize)


def _round_up(v, unit):
    return ((v + unit - 1) // unit) * unit


def _shrink(v, unit):
    """Largest multiple of `unit` <= v // 2, floored at `unit`."""
    return max(unit, (v // 2) // unit * unit)


def _should_use_pallas(x, use_pallas):
    if use_pallas is not None:
        return bool(use_pallas)
    return x.size * x.dtype.itemsize >= _PALLAS_MIN_BYTES


def _pick_tiles(B, D, itemsize, sub, budget):
    """Lane-dense (sub, 128)-aligned tile that fits the per-operand budget."""
    d_tile = min(_round_up(D, 128), _MAX_D_TILE)
    b_tile = min(_round_up(B, sub), _MAX_B_TILE)
    while b_tile * d_tile * itemsize > budget:
        if b_tile > 8 * sub:            # plenty of rows: shrink rows first
            b_tile = _shrink(b_tile, sub)
        elif d_tile > 512:              # then lanes, but keep them dense
            d_tile = _shrink(d_tile, 128)
        elif b_tile > sub:              # then rows down to the dtype floor
            b_tile = _shrink(b_tile, sub)
        elif d_tile > 128:
            d_tile = _shrink(d_tile, 128)
        else:
            break
    return b_tile, d_tile


def _ensure_multi_step(B, D, b_tile, d_tile, sub, min_steps=2):
    """Make sure a 'parallel' axis has >1 step so v7x megacore can shard."""
    def nsteps(bt, dt):
        return pl.cdiv(B, bt) * pl.cdiv(D, dt)

    while nsteps(b_tile, d_tile) < min_steps:
        if d_tile > 128:
            new_d = _shrink(d_tile, 128)
            if pl.cdiv(D, new_d) > pl.cdiv(D, d_tile):
                d_tile = new_d
                continue
        if b_tile > sub:
            new_b = _shrink(b_tile, sub)
            if pl.cdiv(B, new_b) > pl.cdiv(B, b_tile):
                b_tile = new_b
                continue
        break
    return b_tile, d_tile


def _to_lane_dense_2d(x):
    """Reshape to a 2-D, lane-dense (last dim >= 128 when possible) slab."""
    orig_shape = x.shape
    last = x.shape[-1]
    if x.ndim >= 2 and last >= 128:
        return x.reshape(-1, last), orig_shape
    # Narrow last dim: flatten into a lane-dense slab (elementwise -> legal).
    n = x.size
    sub = _sublane_unit(x.dtype)
    best = None
    for lanes in (2048, 1024, 512, 256, 128):
        if n % lanes == 0:
            rows = n // lanes
            if rows % sub == 0:          # fully unmasked tiling: take it
                return x.reshape(rows, lanes), orig_shape
            if best is None:
                best = lanes
    if best is not None:
        return x.reshape(n // best, best), orig_shape
    # Fall back: 2-D with original last dim (masked stores, still correct).
    if x.ndim == 1:
        return x.reshape(1, -1), orig_shape
    return x.reshape(-1, last), orig_shape


# ------------------------------- launcher -----------------------------------

def _launch_elementwise(kernel, x2, *, allow_input_fusion):
    B, D = x2.shape
    itemsize = x2.dtype.itemsize
    sub = _sublane_unit(x2.dtype)
    budget, vmem_limit = _chip_budgets()

    bt, dt = _pick_tiles(B, D, itemsize, sub, budget)
    bt, dt = _ensure_multi_step(B, D, bt, dt, sub)
    grid = (pl.cdiv(B, bt), pl.cdiv(D, dt))

    n = x2.size
    cost = pl.CostEstimate(flops=n, transcendentals=n,
                           bytes_accessed=2 * n * itemsize)
    params = dict(dimension_semantics=("parallel", "parallel"),
                  vmem_limit_bytes=vmem_limit)
    if allow_input_fusion:
        params["allow_input_fusion"] = [True]

    return pl.pallas_call(
        kernel,
        out_shape=jax.ShapeDtypeStruct((B, D), x2.dtype),
        grid=grid,
        in_specs=[pl.BlockSpec((bt, dt), lambda i, j: (i, j))],
        out_specs=pl.BlockSpec((bt, dt), lambda i, j: (i, j)),
        compiler_params=pltpu.CompilerParams(**params),
        cost_estimate=cost,
    )(x2)


# ------------------------------- wrappers -----------------------------------

def log_op(x, *, use_pallas=None):
    """Elementwise natural log (general path: child value already computed)."""
    if x.ndim == 0 or not _should_use_pallas(x, use_pallas):
        return jnp.log(x)
    x2, orig_shape = _to_lane_dense_2d(x)
    out = _launch_elementwise(_log_kernel, x2, allow_input_fusion=True)
    return out.reshape(orig_shape)


def fused_scale_log(x, scale, *, use_pallas=None):
    """log(x * scale) fused into one kernel (single HBM read + write)."""
    if x.ndim == 0 or not _should_use_pallas(x, use_pallas):
        return jnp.log(x * scale)
    x2, orig_shape = _to_lane_dense_2d(x)
    out = _launch_elementwise(_make_scale_log_kernel(scale), x2,
                              allow_input_fusion=False)
    return out.reshape(orig_shape)


# ------------------------- Module-like wrappers ----------------------------

class SymbolNode:
    global_symbol = None
    requires_end_token = False

    def __init__(self, symbol_str, min_num_children, max_num_children):
        self.symbol_str = symbol_str
        self.min_num_children = min_num_children
        self.max_num_children = max_num_children
        no_children = (min_num_children == 0 or
                       (max_num_children is not None and max_num_children == 0))
        self.child_list = None if no_children else []
        self.has_end_of_tree_token = False

    def can_add_child(self):
        if self.child_list is None:
            return False
        if self.requires_end_token and self.has_end_of_tree_token:
            return False
        return (self.max_num_children is None
                or len(self.child_list) + 1 <= self.max_num_children)

    def add_child(self, child_node):
        if self.can_add_child():
            self.child_list.append(child_node)
            return True
        return False

    def count_learnable_params(self):
        if self.child_list is None:
            return 0
        return sum(c.count_learnable_params() for c in self.child_list)

    def __call__(self, batch):
        return self.forward(batch)

    def forward(self, batch):
        raise NotImplementedError()


class _ScaleLeafNode(SymbolNode):
    """Leaf returning batch * scale (no learnable params)."""

    def __init__(self, scale):
        super().__init__(symbol_str=f"x*{scale}", min_num_children=0,
                         max_num_children=0)
        self.scale = float(scale)

    def forward(self, batch):
        return batch * self.scale


class _ShiftLeafNode(SymbolNode):
    """Leaf returning batch + shift (exercises the general, non-fused path)."""

    def __init__(self, shift):
        super().__init__(symbol_str=f"x+{shift}", min_num_children=0,
                         max_num_children=0)
        self.shift = float(shift)

    def forward(self, batch):
        return batch + self.shift


class UnaryOperationNode(SymbolNode):

    def __init__(self, symbol_str):
        super().__init__(symbol_str, min_num_children=1, max_num_children=1)

    def pull_up_child_value(self, batch):
        assert len(self.child_list) == 1
        return self.child_list[0](batch)

    def forward(self, batch):
        raise NotImplementedError()


class LogOperationNode(UnaryOperationNode):
    global_symbol = "log"

    def __init__(self, symbol_str):
        super().__init__(symbol_str)
        # None = auto (size threshold); True/False forces/skips the Pallas path.
        self.use_pallas = None

    def forward(self, batch):
        assert len(self.child_list) == 1
        child = self.child_list[0]
        if isinstance(child, _ScaleLeafNode):
            # Fused hot path: log(batch * scale) in one kernel.
            return fused_scale_log(batch, child.scale, use_pallas=self.use_pallas)
        result = self.pull_up_child_value(batch)
        return log_op(result, use_pallas=self.use_pallas)


# --------------------------------- main ------------------------------------

if __name__ == "__main__":
    key = jax.random.PRNGKey(0)
    k1, k2, k3, k4 = jax.random.split(key, 4)

    # 1) Fused path: log(x * 2.0), forcing the Pallas kernel at demo size.
    B, D = 8, 512
    batch = jax.random.uniform(k1, (B, D), minval=0.5, maxval=2.0,
                               dtype=jnp.float32)
    node = LogOperationNode("log")
    assert node.add_child(_ScaleLeafNode(2.0))
    node.use_pallas = True
    out_fused = node(batch)
    jax.block_until_ready(out_fused)
    ref_fused = jnp.log(batch * 2.0)
    assert out_fused.shape == (B, D) and out_fused.dtype == jnp.float32
    assert jnp.allclose(out_fused, ref_fused, atol=1e-6, rtol=1e-6)

    # 2) General path: log(child(batch)) for an arbitrary child (x + 1.0).
    node2 = LogOperationNode("log")
    assert node2.add_child(_ShiftLeafNode(1.0))
    node2.use_pallas = True
    out_gen = node2(batch)
    jax.block_until_ready(out_gen)
    assert jnp.allclose(out_gen, jnp.log(batch + 1.0), atol=1e-6, rtol=1e-6)

    # 3) 4-D input with narrow last dim -> lane-dense flatten path.
    x4d = jax.random.uniform(k2, (2, 4, 16, 16), minval=0.5, maxval=2.0,
                             dtype=jnp.float32)
    out_4d = node(x4d)
    jax.block_until_ready(out_4d)
    assert out_4d.shape == x4d.shape
    assert jnp.allclose(out_4d, jnp.log(x4d * 2.0), atol=1e-6, rtol=1e-6)

    # 4) Non-(8,128)-divisible shape -> cdiv grid with masked remainder block.
    x_un = jax.random.uniform(k3, (24, 300), minval=0.5, maxval=2.0,
                              dtype=jnp.float32)
    out_un = node2(x_un)
    jax.block_until_ready(out_un)
    assert out_un.shape == x_un.shape
    assert jnp.allclose(out_un, jnp.log(x_un + 1.0), atol=1e-6, rtol=1e-6)

    # 5) bf16 input -> dtype-aware sublane floor; math done in f32 in-kernel.
    x_bf = jax.random.uniform(k4, (16, 384), minval=0.5, maxval=2.0,
                              dtype=jnp.float32).astype(jnp.bfloat16)
    out_bf = node(x_bf)
    jax.block_until_ready(out_bf)
    ref_bf = jnp.log(x_bf.astype(jnp.float32) * 2.0).astype(jnp.bfloat16)
    assert out_bf.dtype == jnp.bfloat16
    assert jnp.allclose(out_bf.astype(jnp.float32), ref_bf.astype(jnp.float32),
                        atol=1e-2, rtol=1e-2)

    # 6) Auto dispatch: this tiny input bypasses pallas_call (still correct).
    node.use_pallas = None
    out_small = node(batch)
    jax.block_until_ready(out_small)
    assert jnp.allclose(out_small, ref_fused, atol=1e-6, rtol=1e-6)

    print("KERNEL_OK")
</pallas_src>

<mosaic_0001>
module attributes {stable_mosaic.version = 11 : i64} {
  func.func @kernel(%arg0: i32, %arg1: i32, %arg2: memref<8x256xf32, #tpu.memory_space<vmem>>, %arg3: memref<8x256xf32, #tpu.memory_space<vmem>>) attributes {dimension_semantics = [#tpu.dimension_semantics<parallel>, #tpu.dimension_semantics<parallel>], iteration_bounds = array<i64: 1, 2>, scalar_prefetch = 0 : i64, scratch_operands = 0 : i64, tpu.core_type = #tpu.core_type<tc>, window_params = [{transform_indices = @transform_0, window_bounds = array<i64: 8, 256>}, {transform_indices = @transform_1, window_bounds = array<i64: 8, 256>}]} {
    %c0 = arith.constant 0 : index
    %c0_0 = arith.constant 0 : index
    %0 = vector.load %arg2[%c0, %c0_0] : memref<8x256xf32, #tpu.memory_space<vmem>>, vector<8x256xf32>
    %cst = arith.constant 2.000000e+00 : f32
    %1 = vector.broadcast %cst : f32 to vector<8x256xf32>
    %2 = arith.mulf %0, %1 : vector<8x256xf32>
    %3 = math.log %2 : vector<8x256xf32>
    %c0_1 = arith.constant 0 : index
    %c0_2 = arith.constant 0 : index
    %4 = vector.load %arg3[%c0_1, %c0_2] : memref<8x256xf32, #tpu.memory_space<vmem>>, vector<8x256xf32>
    tpu.vector_store %arg3[%c0_1, %c0_2], %3 {strides = array<i32>} : memref<8x256xf32, #tpu.memory_space<vmem>>, vector<8x256xf32>,
    return
  }
  func.func @transform_0(%arg0: i32, %arg1: i32) -> (i32, i32) {
    %c0_i32 = arith.constant 0 : i32
    return %arg0, %arg1 : i32, i32
  }
  func.func @transform_1(%arg0: i32, %arg1: i32) -> (i32, i32) {
    %c0_i32 = arith.constant 0 : i32
    return %arg0, %arg1 : i32, i32
  }
}

</mosaic_0001>

<bundles_post_ra>
// kernel: tpu_custom_call.1
= control target key start
LH: loop header
LB: loop body
LE: loop exit
PB: predicated region body
PF: predicated region fallthrough
CT: control target
= control target key end

     0   :  { %6 = vsyncpa [#allocation3], 0  ;;  %s645_s0 = inlined_call_operand.hbm [shape: f32[8,512], index: 0, kind: input, shape index: {}]   ;;  %s646_s1 = inlined_call_operand.hbm [shape: f32[8,512], index: 1, kind: output, shape index: {}]  }
   0x1   :  { %8 = vsyncpa [#allocation3 + $0x1], 0 }
   0x2   :  { %9 = vsyncpa [#allocation4], 0 }
   0x3   :  { %11 = vsyncpa [#allocation4 + $0x1], 0  ;;  %s473_s6 = smov 0   ;;  %s475_s7 = smov 0  }
   0x4   :  { %s477_s8 = smov 0   ;;  %s479_s9 = smov 0  }
   0x5   :  { %s481_s10 = smov 0   ;;  %s483_s11 = smov 0  }
   0x6 LB: > { %s264_s12 = sadd.s32 4294967295, %s459_s11   ;;  %s265_s13 = sadd.s32 4294967294, %s459_s11   ;;  %s459_s11 = sphi %s483_s11, %s17_s11   ;;  %s455_s10 = sphi %s481_s10, %s662_s10   ;;  %s451_s9 = sphi %s479_s9, %s661_s9   ;;  %s447_s8 = sphi %s477_s8, %s660_s8   ;;  %s443_s7 = sphi %s475_s7, %s659_s7   ;;  %s439_s6 = sphi %s473_s6, %s658_s6  }
   0x7   : > { %s26_s14 = sadd.s32 1, %s455_s10  ;;  %s38_s15 = sadd.s32 1, %s447_s8 }
   0x8   : > { %p27_p0 = scmp.ge.s32.totalorder %s26_s14, 2  ;;  %p45_p1 = scmp.ne.s32.totalorder %s447_s8, %s443_s7 }
   0x9   : > { %p46_p2 = scmp.eq.s32.totalorder %s459_s11, 0  ;;  %p51_p3 = scmp.ne.s32.totalorder %s443_s7, %s439_s6 }
   0xa   : > { %s664_s14 = smov (%p27_p0, %s26_s14), 0  ;;  %p52_p5 = scmp.eq.s32.totalorder %s264_s12, 0 }
   0xb   : > { %p514_p4 = por %p46_p2, %p45_p1  ;;  %s34_s17 = ssub.s32 %s455_s10, %s664_s14 }
   0xc   : > { %p77_p6 = scmp.eq.s32.totalorder %s264_s12, 1  ;;  %p36_p7 = scmp.eq.s32.totalorder %s34_s17, 0 }
   0xd   : > { %p520_p8 = por %p52_p5, %p51_p3  ;;  %p83_p10 = scmp.eq.s32.totalorder %s265_s13, 1 }
   0xe   : > { %p524_p9 = por %p77_p6, %p45_p1  ;;  %p293_p13 = scmp.lt.s32.totalorder %s459_s11, 2 }
   0xf   : > { %s529_s20 = scalar_select %p36_p7, %s447_s8, %s38_s15  }
  0x10   : > { %s650_s19 = scalar_select %p524_p9, 1, 0 }
  0x11   : > { %p531_p11 = por %p83_p10, %p51_p3  ;;  %s103_s22 = sand.u32 1, %s447_s8  }
  0x12   : > { %s268_s23 = sshll.u32 %s103_s22, 4  ;;  %s279_s24 = sshll.u32 %s455_s10, 8 }
  0x13   : > { %s651_s21 = scalar_select %p531_p11, 1, 0 }
  0x14   : > { %s542_s27 = scalar_lea.hbm %s645_s0, %s279_s24  ;;  %s107_s28 = scalar_lea.vmem [#allocation2], %s268_s23 }
  0x15   : > { %s117_s29 = sshll.u32 %s107_s28, 4  ;;  %p548_p0 = pnand %p293_p13, %p514_p4  ;;  %s544_s29 = int_to_ptr.vmem [resolvable:$true] %s117_s29 }
  0x16   : > { %s104_s2 = scalar_lea.sflag [#allocation3], %s103_s22  ;;  %s347_s3 = scalar_lea.hbm %s542_s27, 256 }
  0x17   : > { %p348_p3 = scmp.ne.s32.totalorder %s542_s27, %s347_s3  ;;  %p349_p5 = pneg %p548_p0 }
  0x18   : > { %s352_s12 = scalar_lea.hbm %s645_s0, 512  ;;  %p353_p4 = scmp.lt.u32.totalorder %s542_s27, %s645_s0 }
  0x19   : > { %p350_p6 = pnand %p349_p5, %p348_p3  ;;  %p354_p10 = scmp.lt.u32.totalorder %s352_s12, %s347_s3 }
  0x1a   : > { %p356_p12 = scmp.lt.u32.totalorder %s347_s3, %s542_s27 }
  0x1b   : > { %p351_p7 = pneg %p350_p6  ;;  %p355_p13 = por %p354_p10, %p353_p4 }
  0x1d   : > { %p357_p1 = por %p356_p12, %p355_p13 }
  0x1f   : > { %p358_p2 = pnand %p357_p1, %p351_p7 }
  0x21   : > { %361 = shalt.err (!%p358_p2)
}
  0x22   : > { %s362_s16 = scalar_lea.vmem %s544_s29, 256  ;;  %s461_s17 = smov [#allocation2]  }
  0x23   : > { %p363_p3 = scmp.ne.s32.totalorder %s544_s29, %s362_s16  ;;  %s367_s22 = sshll.u32 %s461_s17, 4  ;;  %s368_s22 = int_to_ptr.vmem [resolvable:$false] %s367_s22 }
  0x24   : > { %s369_s23 = scalar_lea.vmem %s368_s22, 512  ;;  %p370_p9 = scmp.lt.s32.totalorder %s544_s29, %s368_s22 }
  0x25   : > { %p365_p6 = pnand %p363_p3, %p349_p5  ;;  %p371_p4 = scmp.lt.s32.totalorder %s369_s23, %s362_s16 }
  0x27   : > { %p366_p11 = pneg %p365_p6  ;;  %p372_p10 = por %p371_p4, %p370_p9 }
  0x29   : > { %p373_p12 = pnand %p372_p10, %p366_p11 }
  0x2b   : > { %376 = shalt.err (!%p373_p12)
}
  0x2c   : > { %288 = dma.hbm_to_vmem [thread:$0]  (!%p548_p0), %s542_s27, 256, %s544_s29, %s104_s2  }
  0x2d   : > { %p653_p1 = scmp.lt.s32.totalorder %s459_s11, 3  ;;  %p654_p2 = scmp.ge.s32.totalorder %s459_s11, 1 }
  0x2f   : > { %p123_p5 = pnand %p654_p2, %p653_p1 }
  0x30   : > { %s584_s24 = sand.u32 (!%p123_p5), 1, %s443_s7  }
  0x31   : > { %126 = sbr.rel (%p123_p5) target bundleno = 88 (0x58), region = 24  ;;  %s272_s25 = sshll.u32 (!%p123_p5), %s584_s24, 4 }
  0x32   : > { %s129_s26 = scalar_lea.sflag (!%p123_p5), [#allocation3], %s584_s24  ;;  %s132_s28 = scalar_lea.vmem (!%p123_p5), [#allocation2], %s272_s25 }
  0x38   : > { %430 = dma.done.wait (%p520_p8), %s129_s26, 256  }
  0x39   : > { %432 = vsyncadd (%p520_p8), %s129_s26, 4294967040  ;;  %v153_v0 = vld [vmem:[%s132_s28] sm:$0xff]  ;;  %v154_v1 = vld [vmem:[%s132_s28 + $0x8] sm:$0xff]  ;;  %s150_s27 = scalar_lea.vmem [#allocation5], %s272_s25  ;;  %s280_s30 = sshll.u32 %s451_s9, 8 }
  0x3a   : > { %v155_v2 = vmul.f32 2.0, %v153_v0  ;;  %v156_v3 = vmul.f32 2.0, %v154_v1  ;;  %s180_s29 = sshll.u32 %s150_s27, 4  ;;  %s598_s3 = scalar_lea.hbm %s646_s1, %s280_s30  ;;  %s593_s29 = int_to_ptr.vmem [resolvable:$true] %s180_s29 }
  0x3b   : > { %s164_s4 = scalar_lea.sflag [#allocation4], %s584_s24  ;;  %s377_s5 = scalar_lea.vmem %s593_s29, 256 }
  0x3c   : > { %343 = vlog2.f32 %v155_v2  ;;  %p378_p8 = scmp.ne.s32.totalorder %s593_s29, %s377_s5  ;;  %p655_p9 = scmp.ne.s32.totalorder %s650_s19, 0 }
  0x3d   : > { %345 = vlog2.f32 %v156_v3  ;;  %s462_s9 = smov [#allocation5]  }
  0x3e   : > { %p379_p11 = pnand %p378_p8, %p655_p9  ;;  %s381_s12 = sshll.u32 %s462_s9, 4  ;;  %s382_s12 = int_to_ptr.vmem [resolvable:$false] %s381_s12 }
  0x3f   : > { %s383_s13 = scalar_lea.vmem %s382_s12, 512  ;;  %p384_p7 = scmp.lt.s32.totalorder %s593_s29, %s382_s12 }
  0x40   : > { %p380_p0 = pneg %p379_p11  ;;  %p385_p13 = scmp.lt.s32.totalorder %s383_s13, %s377_s5 }
  0x42   : > { %p386_p3 = por %p385_p13, %p384_p7 }
  0x44   : > { %p387_p6 = pnand %p386_p3, %p380_p0 }
  0x46   : > { %v344_v4 = vpop.eup %343 }
  0x47   : > { %v346_v5 = vpop.eup %345  ;;  %v158_v6 = vmul.f32 0.6931472, %v344_v4 }
  0x48   : > { %v160_v7 = vmul.f32 0.6931472, %v346_v5 }
  0x49   : > { %161 = vst [vmem:[%s150_s27] sm:$0xff] %v158_v6 }
  0x4a   : > { %162 = vst [vmem:[%s150_s27 + $0x8] sm:$0xff] %v160_v7 }
  0x4b   : > { %390 = shalt.err (!%p387_p6)
}
  0x4c   : > { %s391_s15 = scalar_lea.hbm %s598_s3, 256  ;;  %s395_s22 = scalar_lea.hbm %s646_s1, 512 }
  0x4d   : > { %p392_p4 = scmp.ne.s32.totalorder %s598_s3, %s391_s15  ;;  %p396_p1 = scmp.lt.u32.totalorder %s598_s3, %s646_s1 }
  0x4e   : > { %p397_p2 = scmp.lt.u32.totalorder %s395_s22, %s391_s15  ;;  %p399_p8 = scmp.lt.u32.totalorder %s391_s15, %s598_s3 }
  0x4f   : > { %p393_p10 = pnand %p392_p4, %p655_p9 }
  0x50   : > { %p398_p5 = por %p397_p2, %p396_p1 }
  0x51   : > { %p394_p12 = pneg %p393_p10 }
  0x52   : > { %p400_p11 = por %p399_p8, %p398_p5 }
  0x54   : > { %p401_p0 = pnand %p400_p11, %p394_p12 }
  0x56   : > { %404 = shalt.err (!%p401_p0)
}
  0x57   : > { %283 = dma.vmem_to_hbm [thread:$0]  (%p655_p9), %s593_s29, 256, %s598_s3, %s164_s4  }
  0x58 PF: > { %s192_s25 = sand.u32 1, %s439_s6   ;;  %p656_p7 = scmp.ne.s32.totalorder %s651_s21, 0 }
  0x59   : > { %p657_p13 = scmp.ge.s32.totalorder %s459_s11, 2  ;;  %s193_s26 = scalar_lea.sflag [#allocation4], %s192_s25 }
  0x5b   : > { %p290_p3 = pnand %p657_p13, %p656_p7 }
  0x5d   : > { %434 = dma.done.wait (!%p290_p3), %s193_s26, 256  }
  0x5e   : > { %436 = vsyncadd (!%p290_p3), %s193_s26, 4294967040  ;;  %s17_s11 = sadd.s32 1, %s459_s11   ;;  %s658_s6 = smov %s443_s7 }
  0x5f   : > { %p14_p6 = scmp.ge.s32.totalorder %s17_s11, 4   ;;  %s659_s7 = smov %s447_s8 }
  0x60   : > { %s660_s8 = smov %s529_s20  ;;  %s661_s9 = smov %s455_s10 }
  0x61   : > { %s662_s10 = smov %s664_s14  ;;  %16 = sbr.rel (!%p14_p6) target bundleno = 6 (0x6), region = 69 }
  0x68   :  { %198 = vsyncpa [#allocation3], 1 }
  0x69   :  { %200 = vsyncpa [#allocation3 + $0x1], 1 }
  0x6a   :  { %201 = vsyncpa [#allocation4], 1 }
  0x6b   :  { %203 = vsyncpa [#allocation4 + $0x1], 1 }

</bundles_post_ra>
